<compile_context>
chip_gen: v7x
topology: tpu7x:2x2x1
jax: 0.10.0
libtpu: 0.0.40
codegen_flags: <defaults>
</compile_context>

<pallas_src>
import jax
import jax.numpy as jnp
from jax.experimental import pallas as pl
from jax.experimental.pallas import tpu as pltpu


def _round_up(x, m):
    return ((x + m - 1) // m) * m


def qnetwork_kernel(x_ref, w1_ref, w23_ref, b_ref, out_ref):
    """Full 3-layer MLP forward for one (TB, S) batch tile.

    Weights may be bf16 (MXU-native); accumulation and the bias/ReLU epilogue
    stay in f32.
    """
    x = x_ref[...].astype(w1_ref.dtype)        # (TB, S)
    w1 = w1_ref[...]                           # (S,  P)
    w2 = w23_ref[0]                            # (P,  P)
    w3 = w23_ref[1]                            # (P,  P)
    b1 = b_ref[0:1, :]                         # (1,  P) f32
    b2 = b_ref[1:2, :]
    b3 = b_ref[2:3, :]

    h1 = jnp.dot(x, w1, preferred_element_type=jnp.float32) + b1
    h1 = jnp.maximum(h1, 0.0)
    h2 = jnp.dot(h1.astype(w2.dtype), w2, preferred_element_type=jnp.float32) + b2
    h2 = jnp.maximum(h2, 0.0)
    out = jnp.dot(h2.astype(w3.dtype), w3, preferred_element_type=jnp.float32) + b3
    out_ref[...] = out.astype(out_ref.dtype)


def qnetwork_forward(state, params, *, block_batch=128, use_bf16=True):
    """state: (B, state_size) f32; params: dict of w1,b1,w2,b2,w3,b3 (f32)."""
    w1, b1, w2, b2, w3, b3 = (params["w1"], params["b1"], params["w2"],
                              params["b2"], params["w3"], params["b3"])
    B, S = state.shape
    H1, H2, A = w1.shape[1], w2.shape[1], w3.shape[1]

    # Lane-dense padding: every output-feature dim padded to a multiple of 128.
    P = max(_round_up(H1, 128), _round_up(H2, 128), _round_up(A, 128))

    # Batch tile: multiple of 8 sublanes; grid over batch tiles for real batches.
    TB = block_batch
    if B < TB:
        TB = _round_up(B, 8)
    Bp = _round_up(B, TB)

    w_dtype = jnp.bfloat16 if use_bf16 else jnp.float32

    def pad2(a, rows, cols):
        return jnp.pad(a, ((0, rows - a.shape[0]), (0, cols - a.shape[1])))

    w1p = pad2(w1, S, P).astype(w_dtype)                     # (S, P)
    w2p = pad2(w2, P, P).astype(w_dtype)                     # (P, P)
    w3p = pad2(w3, P, P).astype(w_dtype)                     # (P, P)
    w23 = jnp.stack([w2p, w3p])                              # (2, P, P) single operand
    biases = jnp.stack([pad2(b1, 1, P)[0],                   # (3, P) f32 single operand
                        pad2(b2, 1, P)[0],
                        pad2(b3, 1, P)[0]])
    xp = jnp.pad(state, ((0, Bp - B), (0, 0)))               # (Bp, S)

    out = pl.pallas_call(
        qnetwork_kernel,
        out_shape=jax.ShapeDtypeStruct((Bp, P), jnp.float32),
        grid=(Bp // TB,),
        in_specs=[
            pl.BlockSpec((TB, S), lambda i: (i, 0)),         # batch-tiled state
            pl.BlockSpec((S, P), lambda i: (0, 0)),          # weights: grid-invariant
            pl.BlockSpec((2, P, P), lambda i: (0, 0, 0)),
            pl.BlockSpec((3, P), lambda i: (0, 0)),
        ],
        out_specs=pl.BlockSpec((TB, P), lambda i: (i, 0)),   # lane-dense (128-wide) output
        compiler_params=pltpu.CompilerParams(
            dimension_semantics=("parallel",),               # v7x: batch tiles over 2 TCs
        ),
    )(xp, w1p, w23, biases)

    return out[:B, :A]


def init_params(key, state_size, action_size, fc1_units=64, fc2_units=64):
    """PyTorch nn.Linear default init: U(-1/sqrt(fan_in), 1/sqrt(fan_in))."""
    def linear(k, fan_in, fan_out):
        kw, kb = jax.random.split(k)
        bound = 1.0 / jnp.sqrt(fan_in)
        w = jax.random.uniform(kw, (fan_in, fan_out), jnp.float32, -bound, bound)
        b = jax.random.uniform(kb, (1, fan_out), jnp.float32, -bound, bound)
        return w, b

    k1, k2, k3 = jax.random.split(key, 3)
    w1, b1 = linear(k1, state_size, fc1_units)
    w2, b2 = linear(k2, fc1_units, fc2_units)
    w3, b3 = linear(k3, fc2_units, action_size)
    return {"w1": w1, "b1": b1, "w2": w2, "b2": b2, "w3": w3, "b3": b3}


def reference_forward(state, p):
    h1 = jnp.maximum(state @ p["w1"] + p["b1"], 0.0)
    h2 = jnp.maximum(h1 @ p["w2"] + p["b2"], 0.0)
    return h2 @ p["w3"] + p["b3"]


if __name__ == "__main__":
    key = jax.random.PRNGKey(0)
    k_params, k_s1, k_s2 = jax.random.split(key, 3)

    state_size, action_size = 8, 4   # e.g. LunarLander-v2 obs/action dims
    params = init_params(k_params, state_size, action_size, fc1_units=64, fc2_units=64)

    # 1) Small inference-style batch, exact f32 path (tight tolerance).
    s_small = jax.random.normal(k_s1, (2, state_size), jnp.float32)
    out_small = jax.block_until_ready(qnetwork_forward(s_small, params, use_bf16=False))
    ref_small = reference_forward(s_small, params)
    assert out_small.shape == (2, action_size)
    assert jnp.allclose(out_small, ref_small, atol=1e-5, rtol=1e-5), "f32 mismatch vs reference"

    # 2) Replay-style batch exercising the batch grid (2 tiles) + bf16 MXU path.
    s_big = jax.random.normal(k_s2, (130, state_size), jnp.float32)
    out_big = jax.block_until_ready(qnetwork_forward(s_big, params, use_bf16=True))
    ref_big = reference_forward(s_big, params)
    assert out_big.shape == (130, action_size)
    assert jnp.allclose(out_big, ref_big, atol=5e-2, rtol=5e-2), "bf16 mismatch vs reference"

    print("KERNEL_OK")
</pallas_src>

<mosaic_0001>
module attributes {stable_mosaic.version = 11 : i64} {
  func.func @qnetwork_kernel(%arg0: i32, %arg1: memref<8x8xf32, #tpu.memory_space<vmem>>, %arg2: memref<8x128xf32, #tpu.memory_space<vmem>>, %arg3: memref<2x128x128xf32, #tpu.memory_space<vmem>>, %arg4: memref<3x128xf32, #tpu.memory_space<vmem>>, %arg5: memref<8x128xf32, #tpu.memory_space<vmem>>) attributes {dimension_semantics = [#tpu.dimension_semantics<parallel>], iteration_bounds = array<i64: 1>, scalar_prefetch = 0 : i64, scratch_operands = 0 : i64, tpu.core_type = #tpu.core_type<tc>, window_params = [{transform_indices = @transform_0, window_bounds = array<i64: 8, 8>}, {pipeline_mode = #tpu.pipeline_mode<synchronous>, transform_indices = @transform_1, window_bounds = array<i64: 8, 128>}, {pipeline_mode = #tpu.pipeline_mode<synchronous>, transform_indices = @transform_2, window_bounds = array<i64: 2, 128, 128>}, {pipeline_mode = #tpu.pipeline_mode<synchronous>, transform_indices = @transform_3, window_bounds = array<i64: 3, 128>}, {transform_indices = @transform_4, window_bounds = array<i64: 8, 128>}]} {
    %c0 = arith.constant 0 : index
    %c0_0 = arith.constant 0 : index
    %0 = vector.load %arg1[%c0, %c0_0] : memref<8x8xf32, #tpu.memory_space<vmem>>, vector<8x8xf32>
    %c0_1 = arith.constant 0 : index
    %c0_2 = arith.constant 0 : index
    %1 = vector.load %arg2[%c0_1, %c0_2] : memref<8x128xf32, #tpu.memory_space<vmem>>, vector<8x128xf32>
    %c0_3 = arith.constant 0 : index
    %c0_4 = arith.constant 0 : index
    %c0_5 = arith.constant 0 : index
    %2 = vector.load %arg3[%c0_3, %c0_4, %c0_5] : memref<2x128x128xf32, #tpu.memory_space<vmem>>, vector<1x128x128xf32>
    %3 = vector.shape_cast %2 : vector<1x128x128xf32> to vector<128x128xf32>
    %c1 = arith.constant 1 : index
    %c0_6 = arith.constant 0 : index
    %c0_7 = arith.constant 0 : index
    %4 = vector.load %arg3[%c1, %c0_6, %c0_7] : memref<2x128x128xf32, #tpu.memory_space<vmem>>, vector<1x128x128xf32>
    %5 = vector.shape_cast %4 : vector<1x128x128xf32> to vector<128x128xf32>
    %c0_8 = arith.constant 0 : index
    %c0_9 = arith.constant 0 : index
    %6 = vector.load %arg4[%c0_8, %c0_9] : memref<3x128xf32, #tpu.memory_space<vmem>>, vector<1x128xf32>
    %c1_10 = arith.constant 1 : index
    %c0_11 = arith.constant 0 : index
    %7 = vector.load %arg4[%c1_10, %c0_11] : memref<3x128xf32, #tpu.memory_space<vmem>>, vector<1x128xf32>
    %c2 = arith.constant 2 : index
    %c0_12 = arith.constant 0 : index
    %8 = vector.load %arg4[%c2, %c0_12] : memref<3x128xf32, #tpu.memory_space<vmem>>, vector<1x128xf32>
    %cst = arith.constant dense<0.000000e+00> : vector<8x128xf32>
    %9 = tpu.matmul %0, %1, %cst {dimension_numbers = #tpu.dot_dimension_numbers<[1], [0], [0], [1], [0, 0, 1, 1], [], []>} : vector<8x8xf32>, vector<8x128xf32>, vector<8x128xf32> -> vector<8x128xf32>
    %10 = vector.broadcast %6 : vector<1x128xf32> to vector<8x128xf32>
    %11 = arith.addf %9, %10 : vector<8x128xf32>
    %cst_13 = arith.constant 0.000000e+00 : f32
    %12 = vector.broadcast %cst_13 : f32 to vector<8x128xf32>
    %13 = arith.maximumf %11, %12 : vector<8x128xf32>
    %cst_14 = arith.constant dense<0.000000e+00> : vector<8x128xf32>
    %14 = tpu.matmul %13, %3, %cst_14 {dimension_numbers = #tpu.dot_dimension_numbers<[1], [0], [0], [1], [0, 0, 1, 1], [], []>} : vector<8x128xf32>, vector<128x128xf32>, vector<8x128xf32> -> vector<8x128xf32>
    %15 = vector.broadcast %7 : vector<1x128xf32> to vector<8x128xf32>
    %16 = arith.addf %14, %15 : vector<8x128xf32>
    %cst_15 = arith.constant 0.000000e+00 : f32
    %17 = vector.broadcast %cst_15 : f32 to vector<8x128xf32>
    %18 = arith.maximumf %16, %17 : vector<8x128xf32>
    %cst_16 = arith.constant dense<0.000000e+00> : vector<8x128xf32>
    %19 = tpu.matmul %18, %5, %cst_16 {dimension_numbers = #tpu.dot_dimension_numbers<[1], [0], [0], [1], [0, 0, 1, 1], [], []>} : vector<8x128xf32>, vector<128x128xf32>, vector<8x128xf32> -> vector<8x128xf32>
    %20 = vector.broadcast %8 : vector<1x128xf32> to vector<8x128xf32>
    %21 = arith.addf %19, %20 : vector<8x128xf32>
    %c0_17 = arith.constant 0 : index
    %c0_18 = arith.constant 0 : index
    %22 = vector.load %arg5[%c0_17, %c0_18] : memref<8x128xf32, #tpu.memory_space<vmem>>, vector<8x128xf32>
    tpu.vector_store %arg5[%c0_17, %c0_18], %21 {strides = array<i32>} : memref<8x128xf32, #tpu.memory_space<vmem>>, vector<8x128xf32>,
    return
  }
  func.func @transform_0(%arg0: i32) -> (i32, i32) {
    %c0_i32 = arith.constant 0 : i32
    %c0_i32_0 = arith.constant 0 : i32
    return %arg0, %c0_i32 : i32, i32
  }
  func.func @transform_1(%arg0: i32) -> (i32, i32) {
    %c0_i32 = arith.constant 0 : i32
    %c0_i32_0 = arith.constant 0 : i32
    %c0_i32_1 = arith.constant 0 : i32
    return %c0_i32, %c0_i32_0 : i32, i32
  }
  func.func @transform_2(%arg0: i32) -> (i32, i32, i32) {
    %c0_i32 = arith.constant 0 : i32
    %c0_i32_0 = arith.constant 0 : i32
    %c0_i32_1 = arith.constant 0 : i32
    %c0_i32_2 = arith.constant 0 : i32
    return %c0_i32, %c0_i32_0, %c0_i32_1 : i32, i32, i32
  }
  func.func @transform_3(%arg0: i32) -> (i32, i32) {
    %c0_i32 = arith.constant 0 : i32
    %c0_i32_0 = arith.constant 0 : i32
    %c0_i32_1 = arith.constant 0 : i32
    return %c0_i32, %c0_i32_0 : i32, i32
  }
  func.func @transform_4(%arg0: i32) -> (i32, i32) {
    %c0_i32 = arith.constant 0 : i32
    %c0_i32_0 = arith.constant 0 : i32
    return %arg0, %c0_i32 : i32, i32
  }
}

</mosaic_0001>

<bundles_post_ra>
// kernel: tpu_custom_call.1
= control target key start
LH: loop header
LB: loop body
LE: loop exit
PB: predicated region body
PF: predicated region fallthrough
CT: control target
= control target key end

     0   :  { %9 = vsyncpa [#allocation3], 0  ;;  %s714_s0 = inlined_call_operand.hbm [shape: f32[8,8], index: 0, kind: input, shape index: {}]   ;;  %s715_s1 = inlined_call_operand.hbm [shape: f32[8,128], index: 1, kind: input, shape index: {}]   ;;  %s716_s2 = inlined_call_operand.hbm [shape: f32[2,128,128], index: 2, kind: input, shape index: {}]   ;;  %s717_s3 = inlined_call_operand.vmem [shape: f32[3,128], index: 3, kind: input, shape index: {}]   ;;  %s718_s4 = inlined_call_operand.hbm [shape: f32[8,128], index: 4, kind: output, shape index: {}]  }
   0x1   :  { %10 = vsyncpa [#allocation6], 0 }
   0x2   :  { %11 = vsyncpa [#allocation4], 0  ;;  %s604_s15 = smov [#allocation5]   ;;  %s605_s17 = smov [#allocation2]  }
   0x3   :  { %s28_s16 = sshll.u32 %s604_s15, 4  ;;  %s18_s18 = sshll.u32 %s605_s17, 4  ;;  %s29_s16 = int_to_ptr.vmem [resolvable:$true] %s28_s16  ;;  %s19_s18 = int_to_ptr.vmem [resolvable:$true] %s18_s18 }
   0x4   :  { %s510_s21 = scalar_lea.hbm %s715_s1, 128 }
   0x5   :  { %p511_p0 = scmp.ne.s32.totalorder %s715_s1, %s510_s21  ;;  %p514_p1 = scmp.lt.u32.totalorder %s510_s21, %s715_s1 }
   0x7   :  { %p516_p2 = pnand %p514_p1, %p511_p0 }
   0x9   :  { %519 = shalt.err (!%p516_p2)
}
   0xa   :  { %s520_s26 = scalar_lea.vmem %s29_s16, 128  ;;  %p525_p4 = scmp.lt.s32.totalorder %s29_s16, %s29_s16 }
   0xb   :  { %p521_p3 = scmp.ne.s32.totalorder %s29_s16, %s520_s26  ;;  %p526_p5 = scmp.lt.s32.totalorder %s520_s26, %s520_s26 }
   0xd   :  { %p527_p6 = por %p526_p5, %p525_p4 }
   0xf   :  { %p528_p7 = pnand %p527_p6, %p521_p3 }
  0x11   :  { %531 = shalt.err (!%p528_p7)
}
  0x12   :  { %31 = dma.hbm_to_vmem [thread:$0]  %s715_s1, 128, %s29_s16, [#allocation6]  }
  0x13   :  { %s532_s5 = scalar_lea.hbm %s714_s0, 128 }
  0x14   :  { %p533_p8 = scmp.ne.s32.totalorder %s714_s0, %s532_s5  ;;  %p536_p9 = scmp.lt.u32.totalorder %s532_s5, %s714_s0 }
  0x16   :  { %p538_p10 = pnand %p536_p9, %p533_p8 }
  0x18   :  { %541 = shalt.err (!%p538_p10)
}
  0x19   :  { %s542_s10 = scalar_lea.vmem %s19_s18, 128  ;;  %p547_p12 = scmp.lt.s32.totalorder %s19_s18, %s19_s18 }
  0x1a   :  { %p543_p11 = scmp.ne.s32.totalorder %s19_s18, %s542_s10  ;;  %p548_p13 = scmp.lt.s32.totalorder %s542_s10, %s542_s10 }
  0x1c   :  { %p549_p0 = por %p548_p13, %p547_p12 }
  0x1e   :  { %p550_p1 = pnand %p549_p0, %p543_p11 }
  0x20   :  { %553 = shalt.err (!%p550_p1)
}
  0x21   :  { %21 = dma.hbm_to_vmem [thread:$0]  %s714_s0, 128, %s19_s18, [#allocation3]  }
  0x22   :  { %s606_s12 = smov [#allocation7]   ;;  %s554_s16 = scalar_lea.hbm %s716_s2, 4096 }
  0x23   :  { %s37_s13 = sshll.u32 %s606_s12, 4  ;;  %p555_p2 = scmp.ne.s32.totalorder %s716_s2, %s554_s16  ;;  %s38_s13 = int_to_ptr.vmem [resolvable:$true] %s37_s13 }
  0x24   :  { %p558_p3 = scmp.lt.u32.totalorder %s554_s16, %s716_s2 }
  0x26   :  { %p560_p4 = pnand %p558_p3, %p555_p2 }
  0x28   :  { %563 = shalt.err (!%p560_p4)
}
  0x29   :  { %s564_s22 = scalar_lea.vmem %s38_s13, 4096  ;;  %p569_p6 = scmp.lt.s32.totalorder %s38_s13, %s38_s13 }
  0x2a   :  { %p565_p5 = scmp.ne.s32.totalorder %s38_s13, %s564_s22  ;;  %p570_p7 = scmp.lt.s32.totalorder %s564_s22, %s564_s22 }
  0x2c   :  { %p571_p8 = por %p570_p7, %p569_p6 }
  0x2e   :  { %p572_p9 = pnand %p571_p8, %p565_p5 }
  0x30   :  { %575 = shalt.err (!%p572_p9)
}
  0x31   :  { %s607_s0 = smov 128   ;;  %s608_s18 = smov 8  }
  0x32   :  { %43 = dma.hbm_to_vmem [thread:$0]  %s716_s2, 4096, %s38_s13, [#allocation6], %s607_s0, %s607_s0, %s608_s18  }
  0x33   :  { %598 = dma.done.wait [#allocation3], 128  }
  0x34   :  { %599 = vsyncadd [#allocation3], 4294967168 }
  0x35   :  { %600 = dma.done.wait [#allocation6], 4224  }
  0x36   :  { %601 = vsyncadd [#allocation6], 4294963072  ;;  %v609_v0 = vmov 0.0   ;;  %vm610_vm0 = vmmov 0   ;;  %v611_v1 = vmov 0.0|0.0   ;;  %vm97_vm1 = vcmask 64512  }
  0x37   :  { %378 = vmatprep.subr.mxu0 %v609_v0  ;;  %380 = vmatprep.mubr.msk.f32.mxu0 %vm610_vm0, %v609_v0  ;;  %v56_v2 = vld [vmem:[#allocation5] sm:$0xff]  ;;  %v55_v3 = vld [vmem:[#allocation2] sm:$0xff]  ;;  %v57_v4 = vld [vmem:[#allocation7] sm:$0xff]  ;;  %s612_s30 = smov [#allocation8]  }
  0x38   :  { %453 = vmatprep.subr.bf16.mxu1 %v611_v1  ;;  %415 = vmatprep.mubr.msk.f32.mxu1 %vm610_vm0, %v609_v0  ;;  %v58_v5 = vld [vmem:[#allocation7 + $0x8] sm:$0xff]  ;;  %v59_v6 = vld [vmem:[#allocation7 + $0x10] sm:$0xff]  ;;  %v60_v7 = vld [vmem:[#allocation7 + $0x18] sm:$0xff]  ;;  %s328_s5 = sshll.u32 %s612_s30, 4  ;;  %s329_s5 = int_to_ptr.vmem [resolvable:$true] %s328_s5 }
  0x39   :  { %379 = vmatpush3.msra.mxu0 %v56_v2  ;;  %v454_v8 = vpack.c.bf16 %v58_v5, %v57_v4  ;;  %v457_v9 = vpack.c.bf16 %v60_v7, %v59_v6  ;;  %v61_v10 = vld [vmem:[#allocation7 + $0x20] sm:$0xff]  ;;  %v62_v11 = vld [vmem:[#allocation7 + $0x28] sm:$0xff]  ;;  %v63_v13 = vld [vmem:[#allocation7 + $0x30] sm:$0xff]  ;;  %s576_s6 = scalar_lea.vmem %s329_s5, 128  ;;  %p581_p11 = scmp.lt.s32.totalorder %s329_s5, %s329_s5 }
  0x3a   :  { %381 = vmatmul.mubr.msk.f32.vlgmr.msra.gmra.mrb[0].mxu0 %vm97_vm1, %v55_v3  ;;  %477 = vmatprep.subr.bf16.mxu0 %v611_v1  ;;  %v460_v12 = vpack.c.bf16 %v62_v11, %v61_v10  ;;  %v64_v14 = vld [vmem:[#allocation7 + $0x38] sm:$0xff]  ;;  %v65_v16 = vld [vmem:[#allocation7 + $0x40] sm:$0xff]  ;;  %v66_v17 = vld [vmem:[#allocation7 + $0x48] sm:$0xff]  ;;  %p577_p10 = scmp.ne.s32.totalorder %s329_s5, %s576_s6  ;;  %p582_p12 = scmp.lt.s32.totalorder %s576_s6, %s576_s6 }
  0x3b   :  { %450 = vmatprep.mubr.msk.f32.mxu0 %vm610_vm0, %v609_v0  ;;  %455 = vmatpush3.bf16.msra.mxu1 %v454_v8  ;;  %v463_v15 = vpack.c.bf16 %v64_v14, %v63_v13  ;;  %v466_v18 = vpack.c.bf16 %v66_v17, %v65_v16  ;;  %v67_v19 = vld [vmem:[#allocation7 + $0x50] sm:$0xff]  ;;  %v68_v20 = vld [vmem:[#allocation7 + $0x58] sm:$0xff]  ;;  %v69_v22 = vld [vmem:[#allocation7 + $0x60] sm:$0xff] }
  0x3c   :  { %456 = vmatprep.subr.bf16.mxu1 %v611_v1  ;;  %v469_v21 = vpack.c.bf16 %v68_v20, %v67_v19  ;;  %v70_v23 = vld [vmem:[#allocation7 + $0x68] sm:$0xff]  ;;  %v71_v25 = vld [vmem:[#allocation7 + $0x70] sm:$0xff]  ;;  %v72_v26 = vld [vmem:[#allocation7 + $0x78] sm:$0xff]  ;;  %p583_p13 = por %p582_p12, %p581_p11 }
  0x3d   :  { %v472_v24 = vpack.c.bf16 %v70_v23, %v69_v22  ;;  %v475_v27 = vpack.c.bf16 %v72_v26, %v71_v25  ;;  %v74_v28 = vld [vmem:[#allocation7 + $0x80] sm:$0xff]  ;;  %v75_v29 = vld [vmem:[#allocation7 + $0x88] sm:$0xff]  ;;  %v76_v30 = vld [vmem:[#allocation7 + $0x90] sm:$0xff] }
  0x3e   :  { %v478_v31 = vpack.c.bf16 %v75_v29, %v74_v28  ;;  %v77_v32 = vld [vmem:[#allocation7 + $0x98] sm:$0xff]  ;;  %v78_v34 = vld [vmem:[#allocation7 + $0xa0] sm:$0xff]  ;;  %v79_v35 = vld [vmem:[#allocation7 + $0xa8] sm:$0xff]  ;;  %p584_p0 = pnand %p583_p13, %p577_p10 }
  0x3f   :  { %458 = vmatpush3.bf16.msra.mxu1 %v457_v9  ;;  %v481_v33 = vpack.c.bf16 %v77_v32, %v76_v30  ;;  %v484_v36 = vpack.c.bf16 %v79_v35, %v78_v34  ;;  %v80_v37 = vld [vmem:[#allocation7 + $0xb0] sm:$0xff]  ;;  %v81_v38 = vld [vmem:[#allocation7 + $0xb8] sm:$0xff]  ;;  %v82_v40 = vld [vmem:[#allocation7 + $0xc0] sm:$0xff] }
  0x40   :  { %459 = vmatprep.subr.bf16.mxu1 %v611_v1  ;;  %479 = vmatpush3.bf16.msra.mxu0 %v478_v31  ;;  %v487_v39 = vpack.c.bf16 %v81_v38, %v80_v37  ;;  %v83_v41 = vld [vmem:[#allocation7 + $0xc8] sm:$0xff]  ;;  %v84_v43 = vld [vmem:[#allocation7 + $0xd0] sm:$0xff]  ;;  %v85_v44 = vld [vmem:[#allocation7 + $0xd8] sm:$0xff] }
  0x41   :  { %480 = vmatprep.subr.bf16.mxu0 %v611_v1  ;;  %v490_v42 = vpack.c.bf16 %v83_v41, %v82_v40  ;;  %v493_v45 = vpack.c.bf16 %v85_v44, %v84_v43  ;;  %v86_v46 = vld [vmem:[#allocation7 + $0xe0] sm:$0xff]  ;;  %v87_v47 = vld [vmem:[#allocation7 + $0xe8] sm:$0xff]  ;;  %v338_v49 = vld [vmem:[%s717_s3] ss:$0 sm:$0xff] }
  0x42   :  { %v496_v48 = vpack.c.bf16 %v87_v47, %v86_v46  ;;  %v88_v54 = vld [vmem:[#allocation7 + $0xf0] sm:$0xff]  ;;  %v89_v55 = vld [vmem:[#allocation7 + $0xf8] sm:$0xff] }
  0x43   :  { %461 = vmatpush3.bf16.msra.mxu1 %v460_v12  ;;  %v499_v56 = vpack.c.bf16 %v89_v55, %v88_v54  ;;  %v340_v57 = vld [vmem:[%s717_s3 + $0x1] ss:$0 sm:$0xff]  ;;  %v341_v62 = vld [vmem:[%s717_s3 + $0x2] ss:$0 sm:$0xff] }
  0x44   :  { %462 = vmatprep.subr.bf16.mxu1 %v611_v1  ;;  %482 = vmatpush3.bf16.msra.mxu0 %v481_v33 }
  0x45   :  { %483 = vmatprep.subr.bf16.mxu0 %v611_v1 }
  0x47   :  { %464 = vmatpush3.bf16.msra.mxu1 %v463_v15 }
  0x48   :  { %465 = vmatprep.subr.bf16.mxu1 %v611_v1  ;;  %485 = vmatpush3.bf16.msra.mxu0 %v484_v36 }
  0x49   :  { %486 = vmatprep.subr.bf16.mxu0 %v611_v1 }
  0x4b   :  { %467 = vmatpush3.bf16.msra.mxu1 %v466_v18 }
  0x4c   :  { %468 = vmatprep.subr.bf16.mxu1 %v611_v1  ;;  %488 = vmatpush3.bf16.msra.mxu0 %v487_v39 }
  0x4d   :  { %489 = vmatprep.subr.bf16.mxu0 %v611_v1 }
  0x4f   :  { %470 = vmatpush3.bf16.msra.mxu1 %v469_v21 }
  0x50   :  { %471 = vmatprep.subr.bf16.mxu1 %v611_v1  ;;  %491 = vmatpush3.bf16.msra.mxu0 %v490_v42 }
  0x51   :  { %492 = vmatprep.subr.bf16.mxu0 %v611_v1 }
  0x53   :  { %473 = vmatpush3.bf16.msra.mxu1 %v472_v24 }
  0x54   :  { %474 = vmatprep.subr.bf16.mxu1 %v611_v1  ;;  %494 = vmatpush3.bf16.msra.mxu0 %v493_v45 }
  0x55   :  { %495 = vmatprep.subr.bf16.mxu0 %v611_v1 }
  0x57   :  { %476 = vmatpush3.bf16.msra.mxu1 %v475_v27 }
  0x58   :  { %497 = vmatpush3.bf16.msra.mxu0 %v496_v48 }
  0x59   :  { %498 = vmatprep.subr.bf16.mxu0 %v611_v1 }
  0x5c   :  { %500 = vmatpush3.bf16.msra.mxu0 %v499_v56 }
 0x10d   :  { %v167_v50 = vpop.f32.mrb[0].mxu0 }
 0x10e   :  { %v168_v51 = vadd.f32 %v338_v49, %v167_v50  ;;  %v382_v52 = vpop.f32.mrb[1].mxu0 }
 0x110   :  { %v171_v53 = vmax.f32 %v168_v51, 0.0 }
 0x112   :  { %416 = vmatmul.mubr.f32.vlgmr.msra.gmra.mrb[0].mxu1 %v171_v53 }
 0x1e5   :  { %v242_v58 = vpop.f32.mrb[0].mxu1 }
 0x1e6   :  { %v243_v59 = vadd.f32 %v340_v57, %v242_v58  ;;  %v417_v60 = vpop.f32.mrb[1].mxu1 }
 0x1e8   :  { %v246_v61 = vmax.f32 %v243_v59, 0.0 }
 0x1ea   :  { %451 = vmatmul.mubr.f32.vlgmr.msra.gmra.mrb[2].mxu0 %v246_v61 }
 0x2bd   :  { %v317_v63 = vpop.f32.mrb[2].mxu0 }
 0x2be   :  { %v318_v0 = vadd.f32 %v341_v62, %v317_v63  ;;  %v452_v1 = vpop.f32.mrb[3].mxu0 }
 0x2c0   :  { %321 = vst [vmem:[#allocation8] sm:$0xff] %v318_v0 }
 0x2c1   :  { %587 = shalt.err (!%p584_p0)
}
 0x2c2   :  { %s588_s9 = scalar_lea.hbm %s718_s4, 128 }
 0x2c3   :  { %p589_p1 = scmp.ne.s32.totalorder %s718_s4, %s588_s9  ;;  %p592_p2 = scmp.lt.u32.totalorder %s588_s9, %s718_s4 }
 0x2c5   :  { %p594_p3 = pnand %p592_p2, %p589_p1 }
 0x2c7   :  { %597 = shalt.err (!%p594_p3)
}
 0x2c8   :  { %331 = dma.vmem_to_hbm [thread:$0]  %s329_s5, 128, %s718_s4, [#allocation4]  }
 0x2c9   :  { %602 = dma.done.wait [#allocation4], 128  }
 0x2ca   :  { %603 = vsyncadd [#allocation4], 4294967168 }
 0x2cb   :  { %335 = vsyncpa [#allocation3], 1 }
 0x2cc   :  { %336 = vsyncpa [#allocation6], 1 }
 0x2cd   :  { %337 = vsyncpa [#allocation4], 1 }

</bundles_post_ra>
